<compile_context>
chip_gen: v6e
topology: v6e:2x2x1
jax: 0.10.0
libtpu: 0.0.40
codegen_flags: <defaults>
</compile_context>

<pallas_src>
import jax
import jax.numpy as jnp
from jax.experimental import pallas as pl
from jax.experimental.pallas import tpu as pltpu

_LANE = 1024          # lane-dense inner dim (multiple of 128)
_MAX_TILE_ROWS = 256  # 256 x 1024 x 4B = 1 MiB per array tile
_NCORES = 2           # leading "parallel" grid axis (v7x megacore split)
_SIDE_WEIGHT = 0.4


def _round_up(x, m):
    return ((x + m - 1) // m) * m


def _cdiv(a, b):
    return -(-a // b)


def _bce_loss_kernel(p0_ref, p1_ref, p2_ref, p3_ref, p4_ref, t_ref,
                     out_ref, acc_ref):
    # p*_ref, t_ref: (tm, _LANE) VMEM tiles; out_ref: (8, 128) per-core block;
    # acc_ref: (1, 1) f32 VMEM scratch accumulator (per core).
    step = pl.program_id(1)

    @pl.when(step == 0)
    def _():
        acc_ref[...] = jnp.zeros_like(acc_ref)

    t = t_ref[...].astype(jnp.float32)

    def head_partial(p_ref):
        p = p_ref[...].astype(jnp.float32)
        # PyTorch F.binary_cross_entropy clamps log terms at -100.
        log_p = jnp.maximum(jnp.log(p), -100.0)
        log_1mp = jnp.maximum(jnp.log(1.0 - p), -100.0)
        # -(t*log_p + (1-t)*log_1mp) == -(t*(log_p - log_1mp) + log_1mp)
        bce = -(t * (log_p - log_1mp) + log_1mp)
        return jnp.sum(bce, axis=(0, 1), keepdims=True)  # (1, 1)

    main = head_partial(p0_ref)
    side = (head_partial(p1_ref) + head_partial(p2_ref)
            + head_partial(p3_ref) + head_partial(p4_ref))
    acc_ref[...] += main + _SIDE_WEIGHT * side

    @pl.when(step == pl.num_programs(1) - 1)
    def _():
        out_ref[...] = jnp.broadcast_to(acc_ref[...], out_ref.shape)


def cross_entropy_loss(pred_main, pred_side1, pred_side2, pred_side3,
                       pred_side4, target):
    """All preds are (B, 1, H, W) floats in (0,1); target is (B, H, W)."""
    B, _, H, W = pred_main.shape
    N = B * H * W

    rows = _cdiv(N, _LANE)
    tm = min(_MAX_TILE_ROWS, _round_up(_cdiv(rows, _NCORES), 8))
    steps = _cdiv(rows, _NCORES * tm)
    padded_rows = _NCORES * steps * tm
    total = padded_rows * _LANE

    def prep(x):
        flat = x.reshape(-1)
        if total != N:
            # BCE(p=1, t=1) == -(1*(log1 - max(log0,-100)) + max(log0,-100)) == 0,
            # so padded tail elements contribute nothing to the weighted sum.
            flat = jnp.pad(flat, (0, total - N), constant_values=1.0)
        return flat.reshape(padded_rows, _LANE)

    preds = [prep(p) for p in
             (pred_main, pred_side1, pred_side2, pred_side3, pred_side4)]
    tgt = prep(target)

    in_map = lambda c, i, steps=steps: (c * steps + i, 0)
    tile_spec = pl.BlockSpec((tm, _LANE), in_map)

    partials = pl.pallas_call(
        _bce_loss_kernel,
        out_shape=jax.ShapeDtypeStruct((8, _NCORES * 128), jnp.float32),
        grid_spec=pltpu.PrefetchScalarGridSpec(
            num_scalar_prefetch=0,
            grid=(_NCORES, steps),
            in_specs=[tile_spec] * 6,
            out_specs=pl.BlockSpec((8, 128), lambda c, i: (0, c)),
            scratch_shapes=[pltpu.VMEM((1, 1), jnp.float32)],
        ),
        compiler_params=pltpu.CompilerParams(
            dimension_semantics=("parallel", "arbitrary"),
            vmem_limit_bytes=32 << 20,
        ),
    )(*preds, tgt)

    # Each core's (8,128) output block is filled with its partial weighted sum.
    total_sum = sum(partials[0, c * 128] for c in range(_NCORES))
    # TODO(synk): forward-only; training would need a custom_vjp for the backward.
    return total_sum / jnp.float32(N)


def _reference_loss(preds_list, target):
    """Pure-JAX reference mirroring torch F.binary_cross_entropy semantics."""
    t = target.astype(jnp.float32)

    def bce(p):
        p = p.squeeze(1).astype(jnp.float32)
        log_p = jnp.maximum(jnp.log(p), -100.0)
        log_1mp = jnp.maximum(jnp.log(1.0 - p), -100.0)
        return jnp.mean(-(t * log_p + (1.0 - t) * log_1mp))

    losses = [bce(p) for p in preds_list]
    return losses[0] + 0.4 * (losses[1] + losses[2] + losses[3] + losses[4])


if __name__ == "__main__":
    key = jax.random.PRNGKey(0)
    B, H, W = 2, 16, 16

    keys = jax.random.split(key, 6)
    preds = [
        jax.nn.sigmoid(jax.random.normal(keys[i], (B, 1, H, W), dtype=jnp.float32))
        for i in range(5)
    ]
    # Target is a saliency map in [0, 1] (matches .float() target semantics).
    target = jax.random.uniform(keys[5], (B, H, W), dtype=jnp.float32)

    loss = cross_entropy_loss(*preds, target)
    loss = jax.block_until_ready(loss)

    ref = jax.block_until_ready(_reference_loss(preds, target))
    assert jnp.allclose(loss, ref, rtol=1e-5, atol=1e-5), (loss, ref)

    print("KERNEL_OK")
</pallas_src>

<mosaic_0001>
module attributes {stable_mosaic.version = 11 : i64} {
  func.func @_bce_loss_kernel(%arg0: i32, %arg1: i32, %arg2: memref<8x1024xf32, #tpu.memory_space<vmem>>, %arg3: memref<8x1024xf32, #tpu.memory_space<vmem>>, %arg4: memref<8x1024xf32, #tpu.memory_space<vmem>>, %arg5: memref<8x1024xf32, #tpu.memory_space<vmem>>, %arg6: memref<8x1024xf32, #tpu.memory_space<vmem>>, %arg7: memref<8x1024xf32, #tpu.memory_space<vmem>>, %arg8: memref<8x128xf32, #tpu.memory_space<vmem>>, %arg9: memref<1x1xf32, #tpu.memory_space<vmem>>) attributes {dimension_semantics = [#tpu.dimension_semantics<parallel>, #tpu.dimension_semantics<arbitrary>], iteration_bounds = array<i64: 2, 1>, scalar_prefetch = 0 : i64, scratch_operands = 1 : i64, tpu.core_type = #tpu.core_type<tc>, window_params = [{transform_indices = @transform_0, window_bounds = array<i64: 8, 1024>}, {transform_indices = @transform_1, window_bounds = array<i64: 8, 1024>}, {transform_indices = @transform_2, window_bounds = array<i64: 8, 1024>}, {transform_indices = @transform_3, window_bounds = array<i64: 8, 1024>}, {transform_indices = @transform_4, window_bounds = array<i64: 8, 1024>}, {transform_indices = @transform_5, window_bounds = array<i64: 8, 1024>}, {transform_indices = @transform_6, window_bounds = array<i64: 8, 128>}]} {
    %c0_i32 = arith.constant 0 : i32
    %0 = arith.cmpi eq, %arg1, %c0_i32 : i32
    %1 = arith.extui %0 : i1 to i32
    %c0_i32_0 = arith.constant 0 : i32
    %2 = arith.cmpi ne, %1, %c0_i32_0 : i32
    scf.if %2 {
      %cst_43 = arith.constant 0.000000e+00 : f32
      %111 = vector.broadcast %cst_43 : f32 to vector<1x1xf32>
      %c0_44 = arith.constant 0 : index
      %c0_45 = arith.constant 0 : index
      %112 = vector.load %arg9[%c0_44, %c0_45] : memref<1x1xf32, #tpu.memory_space<vmem>>, vector<1x1xf32>
      tpu.vector_store %arg9[%c0_44, %c0_45], %111 {strides = array<i32>} : memref<1x1xf32, #tpu.memory_space<vmem>>, vector<1x1xf32>,
    } else {
    }
    %c0 = arith.constant 0 : index
    %c0_1 = arith.constant 0 : index
    %3 = vector.load %arg7[%c0, %c0_1] : memref<8x1024xf32, #tpu.memory_space<vmem>>, vector<8x1024xf32>
    %c0_2 = arith.constant 0 : index
    %c0_3 = arith.constant 0 : index
    %4 = vector.load %arg2[%c0_2, %c0_3] : memref<8x1024xf32, #tpu.memory_space<vmem>>, vector<8x1024xf32>
    %5 = math.log %4 : vector<8x1024xf32>
    %cst = arith.constant -1.000000e+02 : f32
    %6 = vector.broadcast %cst : f32 to vector<8x1024xf32>
    %7 = arith.maximumf %5, %6 : vector<8x1024xf32>
    %cst_4 = arith.constant 1.000000e+00 : f32
    %8 = vector.broadcast %cst_4 : f32 to vector<8x1024xf32>
    %9 = arith.subf %8, %4 : vector<8x1024xf32>
    %10 = math.log %9 : vector<8x1024xf32>
    %cst_5 = arith.constant -1.000000e+02 : f32
    %11 = vector.broadcast %cst_5 : f32 to vector<8x1024xf32>
    %12 = arith.maximumf %10, %11 : vector<8x1024xf32>
    %13 = arith.subf %7, %12 : vector<8x1024xf32>
    %14 = arith.mulf %3, %13 : vector<8x1024xf32>
    %15 = arith.addf %14, %12 : vector<8x1024xf32>
    %cst_6 = arith.constant 0.000000e+00 : f32
    %16 = vector.broadcast %cst_6 : f32 to vector<8x1024xf32>
    %17 = arith.subf %16, %15 : vector<8x1024xf32>
    %18 = vector.shape_cast %17 : vector<8x1024xf32> to vector<1x8x1024xf32>
    %cst_7 = arith.constant dense<0.000000e+00> : vector<1xf32>
    %19 = vector.multi_reduction <add>, %18, %cst_7 [1, 2] : vector<1x8x1024xf32> to vector<1xf32>
    %20 = vector.shape_cast %19 : vector<1xf32> to vector<1x1x1xf32>
    %21 = vector.extract %20[0, 0, 0] : f32 from vector<1x1x1xf32>
    %22 = vector.broadcast %21 : f32 to vector<1x1xf32>
    %c0_8 = arith.constant 0 : index
    %c0_9 = arith.constant 0 : index
    %23 = vector.load %arg3[%c0_8, %c0_9] : memref<8x1024xf32, #tpu.memory_space<vmem>>, vector<8x1024xf32>
    %24 = math.log %23 : vector<8x1024xf32>
    %cst_10 = arith.constant -1.000000e+02 : f32
    %25 = vector.broadcast %cst_10 : f32 to vector<8x1024xf32>
    %26 = arith.maximumf %24, %25 : vector<8x1024xf32>
    %cst_11 = arith.constant 1.000000e+00 : f32
    %27 = vector.broadcast %cst_11 : f32 to vector<8x1024xf32>
    %28 = arith.subf %27, %23 : vector<8x1024xf32>
    %29 = math.log %28 : vector<8x1024xf32>
    %cst_12 = arith.constant -1.000000e+02 : f32
    %30 = vector.broadcast %cst_12 : f32 to vector<8x1024xf32>
    %31 = arith.maximumf %29, %30 : vector<8x1024xf32>
    %32 = arith.subf %26, %31 : vector<8x1024xf32>
    %33 = arith.mulf %3, %32 : vector<8x1024xf32>
    %34 = arith.addf %33, %31 : vector<8x1024xf32>
    %cst_13 = arith.constant 0.000000e+00 : f32
    %35 = vector.broadcast %cst_13 : f32 to vector<8x1024xf32>
    %36 = arith.subf %35, %34 : vector<8x1024xf32>
    %37 = vector.shape_cast %36 : vector<8x1024xf32> to vector<1x8x1024xf32>
    %cst_14 = arith.constant dense<0.000000e+00> : vector<1xf32>
    %38 = vector.multi_reduction <add>, %37, %cst_14 [1, 2] : vector<1x8x1024xf32> to vector<1xf32>
    %39 = vector.shape_cast %38 : vector<1xf32> to vector<1x1x1xf32>
    %40 = vector.extract %39[0, 0, 0] : f32 from vector<1x1x1xf32>
    %41 = vector.broadcast %40 : f32 to vector<1x1xf32>
    %c0_15 = arith.constant 0 : index
    %c0_16 = arith.constant 0 : index
    %42 = vector.load %arg4[%c0_15, %c0_16] : memref<8x1024xf32, #tpu.memory_space<vmem>>, vector<8x1024xf32>
    %43 = math.log %42 : vector<8x1024xf32>
    %cst_17 = arith.constant -1.000000e+02 : f32
    %44 = vector.broadcast %cst_17 : f32 to vector<8x1024xf32>
    %45 = arith.maximumf %43, %44 : vector<8x1024xf32>
    %cst_18 = arith.constant 1.000000e+00 : f32
    %46 = vector.broadcast %cst_18 : f32 to vector<8x1024xf32>
    %47 = arith.subf %46, %42 : vector<8x1024xf32>
    %48 = math.log %47 : vector<8x1024xf32>
    %cst_19 = arith.constant -1.000000e+02 : f32
    %49 = vector.broadcast %cst_19 : f32 to vector<8x1024xf32>
    %50 = arith.maximumf %48, %49 : vector<8x1024xf32>
    %51 = arith.subf %45, %50 : vector<8x1024xf32>
    %52 = arith.mulf %3, %51 : vector<8x1024xf32>
    %53 = arith.addf %52, %50 : vector<8x1024xf32>
    %cst_20 = arith.constant 0.000000e+00 : f32
    %54 = vector.broadcast %cst_20 : f32 to vector<8x1024xf32>
    %55 = arith.subf %54, %53 : vector<8x1024xf32>
    %56 = vector.shape_cast %55 : vector<8x1024xf32> to vector<1x8x1024xf32>
    %cst_21 = arith.constant dense<0.000000e+00> : vector<1xf32>
    %57 = vector.multi_reduction <add>, %56, %cst_21 [1, 2] : vector<1x8x1024xf32> to vector<1xf32>
    %58 = vector.shape_cast %57 : vector<1xf32> to vector<1x1x1xf32>
    %59 = vector.extract %58[0, 0, 0] : f32 from vector<1x1x1xf32>
    %60 = vector.broadcast %59 : f32 to vector<1x1xf32>
    %61 = arith.addf %41, %60 : vector<1x1xf32>
    %c0_22 = arith.constant 0 : index
    %c0_23 = arith.constant 0 : index
    %62 = vector.load %arg5[%c0_22, %c0_23] : memref<8x1024xf32, #tpu.memory_space<vmem>>, vector<8x1024xf32>
    %63 = math.log %62 : vector<8x1024xf32>
    %cst_24 = arith.constant -1.000000e+02 : f32
    %64 = vector.broadcast %cst_24 : f32 to vector<8x1024xf32>
    %65 = arith.maximumf %63, %64 : vector<8x1024xf32>
    %cst_25 = arith.constant 1.000000e+00 : f32
    %66 = vector.broadcast %cst_25 : f32 to vector<8x1024xf32>
    %67 = arith.subf %66, %62 : vector<8x1024xf32>
    %68 = math.log %67 : vector<8x1024xf32>
    %cst_26 = arith.constant -1.000000e+02 : f32
    %69 = vector.broadcast %cst_26 : f32 to vector<8x1024xf32>
    %70 = arith.maximumf %68, %69 : vector<8x1024xf32>
    %71 = arith.subf %65, %70 : vector<8x1024xf32>
    %72 = arith.mulf %3, %71 : vector<8x1024xf32>
    %73 = arith.addf %72, %70 : vector<8x1024xf32>
    %cst_27 = arith.constant 0.000000e+00 : f32
    %74 = vector.broadcast %cst_27 : f32 to vector<8x1024xf32>
    %75 = arith.subf %74, %73 : vector<8x1024xf32>
    %76 = vector.shape_cast %75 : vector<8x1024xf32> to vector<1x8x1024xf32>
    %cst_28 = arith.constant dense<0.000000e+00> : vector<1xf32>
    %77 = vector.multi_reduction <add>, %76, %cst_28 [1, 2] : vector<1x8x1024xf32> to vector<1xf32>
    %78 = vector.shape_cast %77 : vector<1xf32> to vector<1x1x1xf32>
    %79 = vector.extract %78[0, 0, 0] : f32 from vector<1x1x1xf32>
    %80 = vector.broadcast %79 : f32 to vector<1x1xf32>
    %81 = arith.addf %61, %80 : vector<1x1xf32>
    %c0_29 = arith.constant 0 : index
    %c0_30 = arith.constant 0 : index
    %82 = vector.load %arg6[%c0_29, %c0_30] : memref<8x1024xf32, #tpu.memory_space<vmem>>, vector<8x1024xf32>
    %83 = math.log %82 : vector<8x1024xf32>
    %cst_31 = arith.constant -1.000000e+02 : f32
    %84 = vector.broadcast %cst_31 : f32 to vector<8x1024xf32>
    %85 = arith.maximumf %83, %84 : vector<8x1024xf32>
    %cst_32 = arith.constant 1.000000e+00 : f32
    %86 = vector.broadcast %cst_32 : f32 to vector<8x1024xf32>
    %87 = arith.subf %86, %82 : vector<8x1024xf32>
    %88 = math.log %87 : vector<8x1024xf32>
    %cst_33 = arith.constant -1.000000e+02 : f32
    %89 = vector.broadcast %cst_33 : f32 to vector<8x1024xf32>
    %90 = arith.maximumf %88, %89 : vector<8x1024xf32>
    %91 = arith.subf %85, %90 : vector<8x1024xf32>
    %92 = arith.mulf %3, %91 : vector<8x1024xf32>
    %93 = arith.addf %92, %90 : vector<8x1024xf32>
    %cst_34 = arith.constant 0.000000e+00 : f32
    %94 = vector.broadcast %cst_34 : f32 to vector<8x1024xf32>
    %95 = arith.subf %94, %93 : vector<8x1024xf32>
    %96 = vector.shape_cast %95 : vector<8x1024xf32> to vector<1x8x1024xf32>
    %cst_35 = arith.constant dense<0.000000e+00> : vector<1xf32>
    %97 = vector.multi_reduction <add>, %96, %cst_35 [1, 2] : vector<1x8x1024xf32> to vector<1xf32>
    %98 = vector.shape_cast %97 : vector<1xf32> to vector<1x1x1xf32>
    %99 = vector.extract %98[0, 0, 0] : f32 from vector<1x1x1xf32>
    %100 = vector.broadcast %99 : f32 to vector<1x1xf32>
    %101 = arith.addf %81, %100 : vector<1x1xf32>
    %c0_36 = arith.constant 0 : index
    %c0_37 = arith.constant 0 : index
    %102 = vector.load %arg9[%c0_36, %c0_37] : memref<1x1xf32, #tpu.memory_space<vmem>>, vector<1x1xf32>
    %cst_38 = arith.constant 4.000000e-01 : f32
    %103 = vector.broadcast %cst_38 : f32 to vector<1x1xf32>
    %104 = arith.mulf %103, %101 : vector<1x1xf32>
    %105 = arith.addf %22, %104 : vector<1x1xf32>
    %106 = arith.addf %102, %105 : vector<1x1xf32>
    %c0_39 = arith.constant 0 : index
    %c0_40 = arith.constant 0 : index
    %107 = vector.load %arg9[%c0_39, %c0_40] : memref<1x1xf32, #tpu.memory_space<vmem>>, vector<1x1xf32>
    tpu.vector_store %arg9[%c0_39, %c0_40], %106 {strides = array<i32>} : memref<1x1xf32, #tpu.memory_space<vmem>>, vector<1x1xf32>,
    %c0_i32_41 = arith.constant 0 : i32
    %108 = arith.cmpi eq, %arg1, %c0_i32_41 : i32
    %109 = arith.extui %108 : i1 to i32
    %c0_i32_42 = arith.constant 0 : i32
    %110 = arith.cmpi ne, %109, %c0_i32_42 : i32
    scf.if %110 {
      %c0_43 = arith.constant 0 : index
      %c0_44 = arith.constant 0 : index
      %111 = vector.load %arg9[%c0_43, %c0_44] : memref<1x1xf32, #tpu.memory_space<vmem>>, vector<1x1xf32>
      %112 = vector.shape_cast %111 : vector<1x1xf32> to vector<1x1xf32>
      %113 = vector.broadcast %112 : vector<1x1xf32> to vector<8x128xf32>
      %c0_45 = arith.constant 0 : index
      %c0_46 = arith.constant 0 : index
      %114 = vector.load %arg8[%c0_45, %c0_46] : memref<8x128xf32, #tpu.memory_space<vmem>>, vector<8x128xf32>
      tpu.vector_store %arg8[%c0_45, %c0_46], %113 {strides = array<i32>} : memref<8x128xf32, #tpu.memory_space<vmem>>, vector<8x128xf32>,
    } else {
    }
    return
  }
  func.func @transform_0(%arg0: i32, %arg1: i32) -> (i32, i32) {
    %c1_i32 = arith.constant 1 : i32
    %0 = arith.muli %arg0, %c1_i32 : i32
    %1 = arith.addi %0, %arg1 : i32
    %c0_i32 = arith.constant 0 : i32
    %c0_i32_0 = arith.constant 0 : i32
    return %1, %c0_i32 : i32, i32
  }
  func.func @transform_1(%arg0: i32, %arg1: i32) -> (i32, i32) {
    %c1_i32 = arith.constant 1 : i32
    %0 = arith.muli %arg0, %c1_i32 : i32
    %1 = arith.addi %0, %arg1 : i32
    %c0_i32 = arith.constant 0 : i32
    %c0_i32_0 = arith.constant 0 : i32
    return %1, %c0_i32 : i32, i32
  }
  func.func @transform_2(%arg0: i32, %arg1: i32) -> (i32, i32) {
    %c1_i32 = arith.constant 1 : i32
    %0 = arith.muli %arg0, %c1_i32 : i32
    %1 = arith.addi %0, %arg1 : i32
    %c0_i32 = arith.constant 0 : i32
    %c0_i32_0 = arith.constant 0 : i32
    return %1, %c0_i32 : i32, i32
  }
  func.func @transform_3(%arg0: i32, %arg1: i32) -> (i32, i32) {
    %c1_i32 = arith.constant 1 : i32
    %0 = arith.muli %arg0, %c1_i32 : i32
    %1 = arith.addi %0, %arg1 : i32
    %c0_i32 = arith.constant 0 : i32
    %c0_i32_0 = arith.constant 0 : i32
    return %1, %c0_i32 : i32, i32
  }
  func.func @transform_4(%arg0: i32, %arg1: i32) -> (i32, i32) {
    %c1_i32 = arith.constant 1 : i32
    %0 = arith.muli %arg0, %c1_i32 : i32
    %1 = arith.addi %0, %arg1 : i32
    %c0_i32 = arith.constant 0 : i32
    %c0_i32_0 = arith.constant 0 : i32
    return %1, %c0_i32 : i32, i32
  }
  func.func @transform_5(%arg0: i32, %arg1: i32) -> (i32, i32) {
    %c1_i32 = arith.constant 1 : i32
    %0 = arith.muli %arg0, %c1_i32 : i32
    %1 = arith.addi %0, %arg1 : i32
    %c0_i32 = arith.constant 0 : i32
    %c0_i32_0 = arith.constant 0 : i32
    return %1, %c0_i32 : i32, i32
  }
  func.func @transform_6(%arg0: i32, %arg1: i32) -> (i32, i32) {
    %c0_i32 = arith.constant 0 : i32
    %c0_i32_0 = arith.constant 0 : i32
    return %c0_i32, %arg0 : i32, i32
  }
}

</mosaic_0001>

<bundles_post_ra>
// kernel: tpu_custom_call.1
= control target key start
LH: loop header
LB: loop body
LE: loop exit
PB: predicated region body
PF: predicated region fallthrough
CT: control target
= control target key end

     0   :  { %s2296_s0 = inlined_call_operand.hbm [shape: f32[16,1024], index: 0, kind: input, shape index: {}]   ;;  %s2297_s1 = inlined_call_operand.hbm [shape: f32[16,1024], index: 1, kind: input, shape index: {}]   ;;  %s2298_s2 = inlined_call_operand.hbm [shape: f32[16,1024], index: 2, kind: input, shape index: {}]   ;;  %s2299_s3 = inlined_call_operand.hbm [shape: f32[16,1024], index: 3, kind: input, shape index: {}]   ;;  %s2300_s4 = inlined_call_operand.hbm [shape: f32[16,1024], index: 4, kind: input, shape index: {}]   ;;  %s2301_s5 = inlined_call_operand.hbm [shape: f32[16,1024], index: 5, kind: input, shape index: {}]   ;;  %s2302_s6 = inlined_call_operand.hbm [shape: f32[8,256], index: 6, kind: output, shape index: {}]  }
   0x1   :  { %2309 = sst [smem:[#allocation26_spill]] %s2297_s1 }
   0x2   :  { %2310 = sst [smem:[#allocation27_spill]] %s2299_s3 }
   0x3   :  { %11 = vsyncpa [#allocation4], 0 }
   0x4   :  { %13 = vsyncpa [#allocation4 + $0x1], 0 }
   0x5   :  { %14 = vsyncpa [#allocation7], 0 }
   0x6   :  { %16 = vsyncpa [#allocation7 + $0x1], 0 }
   0x7   :  { %17 = vsyncpa [#allocation10], 0 }
   0x8   :  { %19 = vsyncpa [#allocation10 + $0x1], 0 }
   0x9   :  { %20 = vsyncpa [#allocation13], 0 }
   0xa   :  { %22 = vsyncpa [#allocation13 + $0x1], 0 }
   0xb   :  { %23 = vsyncpa [#allocation5], 0 }
   0xc   :  { %25 = vsyncpa [#allocation5 + $0x1], 0  ;;  %s1905_s21 = smov 0   ;;  %s1907_s22 = smov 0  }
   0xd   :  { %s1909_s23 = smov 0   ;;  %s1911_s24 = smov 0  }
   0xe   :  { %s1913_s25 = smov 0   ;;  %s1915_s26 = smov 0  }
   0xf LB: > { %2311 = sst [smem:[#allocation20_spill]] %s1847_s23  ;;  %s1936_s27 = sadd.s32 4294967295, %s1859_s26   ;;  %s1859_s26 = sphi %s1915_s26, %s31_s26   ;;  %s1855_s25 = sphi %s1913_s25, %s2332_s25   ;;  %s1851_s24 = sphi %s1911_s24, %s2331_s24   ;;  %s1847_s23 = sphi %s1909_s23, %s2330_s23   ;;  %s1843_s22 = sphi %s1907_s22, %s2334_s22   ;;  %s1839_s21 = sphi %s1905_s21, %s2333_s21  }
  0x10   : > { %2312 = sst [smem:[#allocation21_spill]] %s1855_s25  ;;  %s1298_s28 = sadd.s32 4294967294, %s1859_s26  }
  0x11   : > { %2313 = sst [smem:[#allocation22_spill]] %s1859_s26  ;;  %s43_s29 = sadd.s32 1, %s1855_s25 }
  0x12   : > { %s52_s30 = sadd.s32 1, %s1847_s23  ;;  %p45_p0 = scmp.ge.s32.totalorder %s43_s29, 2 }
  0x13   : > { %p59_p1 = scmp.ne.s32.totalorder %s1847_s23, %s1843_s22  ;;  %p60_p2 = scmp.eq.s32.totalorder %s1859_s26, 0 }
  0x14   : > { %p65_p3 = scmp.ne.s32.totalorder %s1843_s22, %s1839_s21  ;;  %s2336_s29 = smov (%p45_p0, %s43_s29), 0 }
  0x15   : > { %2314 = sst [smem:[#allocation23_spill]] %s2336_s29  ;;  %p1948_p4 = por %p60_p2, %p59_p1 }
  0x16   : > { %p66_p5 = scmp.eq.s32.totalorder %s1936_s27, 0  ;;  %s49_s8 = ssub.s32 %s1855_s25, %s2336_s29 }
  0x17   : > { %p229_p6 = scmp.eq.s32.totalorder %s1936_s27, 1  ;;  %p50_p7 = scmp.eq.s32.totalorder %s49_s8, 0 }
  0x18   : > { %p1956_p8 = por %p66_p5, %p65_p3  ;;  %p235_p10 = scmp.eq.s32.totalorder %s1298_s28, 1 }
  0x19   : > { %p1960_p9 = por %p229_p6, %p59_p1  ;;  %p1385_p13 = scmp.lt.s32.totalorder %s1859_s26, 2 }
  0x1a   : > { %s1965_s11 = scalar_select %p50_p7, %s1847_s23, %s52_s30  }
  0x1b   : > { %p1967_p11 = por %p235_p10, %p65_p3  ;;  %s1974_s13 = sand.u32 1, %s1847_s23  }
  0x1c   : > { %2318 = sst [smem:[#allocation24_spill]] %s1965_s11  ;;  %s1977_s14 = sshll.u32 %s1974_s13, 6 }
  0x1d   : > { %s2319_s12 = scalar_select %p1967_p11, 1, 0 }
  0x1e   : > { %s1980_s15 = sshll.u32 %s1855_s25, 10  ;;  %p1984_p0 = pnand %p1385_p13, %p1948_p4 }
  0x1f   : > { %2320 = sst [smem:[#allocation25_spill]] %s2319_s12  ;;  %s275_s17 = sand.u32 1, %s1859_s26  }
  0x20   : > { %s2322_s1 = sld [smem:[#allocation26_spill]]  ;;  %s279_s28 = scalar_lea.vmem [#allocation6], %s1977_s14 }
  0x21   : > { %s288_s30 = sshll.u32 %s279_s28, 4  ;;  %p1319_p1 = scmp.ge.s32.totalorder %s1859_s26, 1  ;;  %s289_s30 = int_to_ptr.vmem [resolvable:$true] %s288_s30 }
  0x22   : > { %p373_p2 = scmp.lt.s32.totalorder %s1859_s26, 3  ;;  %s1996_s8 = scalar_lea.sflag [#allocation7], %s275_s17 }
  0x23   : > { %p2000_p3 = pneg %p1984_p0  ;;  %s1612_s29 = scalar_lea.vmem %s289_s30, 1024 }
  0x24   : > { %p1613_p4 = scmp.ne.s32.totalorder %s289_s30, %s1612_s29  ;;  %s1861_s18 = smov [#allocation6]  }
  0x25   : > { %s1617_s19 = sshll.u32 %s1861_s18, 4  ;;  %s1618_s19 = int_to_ptr.vmem [resolvable:$false] %s1617_s19 }
  0x26   : > { %s286_s20 = scalar_lea.hbm %s2322_s1, %s1980_s15  ;;  %p1615_p5 = pnand %p1613_p4, %p2000_p3 }
  0x27   : > { %s1619_s28 = scalar_lea.vmem %s1618_s19, 2048  ;;  %p1620_p7 = scmp.lt.s32.totalorder %s289_s30, %s1618_s19 }
  0x28   : > { %p1616_p6 = pneg %p1615_p5  ;;  %p1621_p10 = scmp.lt.s32.totalorder %s1619_s28, %s1612_s29 }
  0x2a   : > { %p1622_p13 = por %p1621_p10, %p1620_p7 }
  0x2c   : > { %p1623_p12 = pnand %p1622_p13, %p1616_p6 }
  0x2e   : > { %1626 = shalt.err (!%p1623_p12)
}
  0x2f   : > { %1368 = dma.hbm_to_vmem [thread:$0]  (!%p1984_p0), %s286_s20, 1024, %s289_s30, %s1996_s8  }
  0x30   : > { %p2013_p4 = pnand %p1319_p1, %p373_p2  ;;  %s2325_s3 = sld [smem:[#allocation27_spill]] }
  0x31   : > { %s319_s1 = scalar_lea.vmem [#allocation9], %s1977_s14  ;;  %s2022_s11 = scalar_lea.sflag [#allocation10], %s275_s17 }
  0x32   : > { %s328_s25 = sshll.u32 %s319_s1, 4  ;;  %s1862_s20 = smov [#allocation9]   ;;  %s329_s25 = int_to_ptr.vmem [resolvable:$true] %s328_s25 }
  0x33   : > { %s1640_s23 = scalar_lea.vmem %s329_s25, 1024  ;;  %s1645_s30 = sshll.u32 %s1862_s20, 4  ;;  %s1646_s30 = int_to_ptr.vmem [resolvable:$false] %s1645_s30 }
  0x34   : > { %p1641_p12 = scmp.ne.s32.totalorder %s329_s25, %s1640_s23  ;;  %s1647_s26 = scalar_lea.vmem %s1646_s30, 2048 }
  0x35   : > { %p1648_p1 = scmp.lt.s32.totalorder %s329_s25, %s1646_s30  ;;  %p1649_p2 = scmp.lt.s32.totalorder %s1647_s26, %s1640_s23 }
  0x36   : > { %s326_s28 = scalar_lea.hbm %s2325_s3, %s1980_s15  ;;  %p1643_p5 = pnand %p1641_p12, %p2000_p3 }
  0x37   : > { %p1650_p7 = por %p1649_p2, %p1648_p1 }
  0x38   : > { %p1644_p6 = pneg %p1643_p5 }
  0x3a   : > { %p1651_p10 = pnand %p1650_p7, %p1644_p6 }
  0x3c   : > { %1654 = shalt.err (!%p1651_p10)
}
  0x3d   : > { %1374 = dma.hbm_to_vmem [thread:$0]  (!%p1984_p0), %s326_s28, 1024, %s329_s25, %s2022_s11  }
  0x3e   : > { %s266_s19 = scalar_lea.hbm %s2296_s0, %s1980_s15  ;;  %s259_s29 = scalar_lea.vmem [#allocation3], %s1977_s14 }
  0x3f   : > { %s268_s20 = sshll.u32 %s259_s29, 4  ;;  %s256_s30 = scalar_lea.sflag [#allocation4], %s1974_s13  ;;  %s269_s20 = int_to_ptr.vmem [resolvable:$true] %s268_s20 }
  0x40   : > { %s1668_s23 = scalar_lea.vmem %s269_s20, 1024  ;;  %s1863_s26 = smov [#allocation3]  }
  0x41   : > { %p1669_p13 = scmp.ne.s32.totalorder %s269_s20, %s1668_s23  ;;  %s1673_s3 = sshll.u32 %s1863_s26, 4  ;;  %s1674_s3 = int_to_ptr.vmem [resolvable:$false] %s1673_s3 }
  0x42   : > { %s1675_s12 = scalar_lea.vmem %s1674_s3, 2048  ;;  %p1676_p6 = scmp.lt.s32.totalorder %s269_s20, %s1674_s3 }
  0x43   : > { %p1671_p12 = pnand %p1669_p13, %p2000_p3  ;;  %p1677_p1 = scmp.lt.s32.totalorder %s1675_s12, %s1668_s23 }
  0x45   : > { %p1672_p5 = pneg %p1671_p12  ;;  %p1678_p2 = por %p1677_p1, %p1676_p6 }
  0x47   : > { %p1679_p7 = pnand %p1678_p2, %p1672_p5 }
  0x49   : > { %1682 = shalt.err (!%p1679_p7)
}
  0x4a   : > { %1365 = dma.hbm_to_vmem [thread:$0]  (!%p1984_p0), %s266_s19, 1024, %s269_s20, %s256_s30  }
  0x4b   : > { %s306_s1 = scalar_lea.hbm %s2298_s2, %s1980_s15  ;;  %s299_s17 = scalar_lea.vmem [#allocation8], %s1977_s14 }
  0x4c   : > { %s308_s29 = sshll.u32 %s299_s17, 4  ;;  %s1864_s3 = smov [#allocation8]   ;;  %s309_s29 = int_to_ptr.vmem [resolvable:$true] %s308_s29 }
  0x4d   : > { %s1696_s26 = scalar_lea.vmem %s309_s29, 1024  ;;  %s1701_s12 = sshll.u32 %s1864_s3, 4  ;;  %s1702_s12 = int_to_ptr.vmem [resolvable:$false] %s1701_s12 }
  0x4e   : > { %p1697_p10 = scmp.ne.s32.totalorder %s309_s29, %s1696_s26  ;;  %s1703_s23 = scalar_lea.vmem %s1702_s12, 2048 }
  0x4f   : > { %p1704_p5 = scmp.lt.s32.totalorder %s309_s29, %s1702_s12  ;;  %p1705_p6 = scmp.lt.s32.totalorder %s1703_s23, %s1696_s26 }
  0x50   : > { %p1699_p13 = pnand %p1697_p10, %p2000_p3 }
  0x51   : > { %p1706_p1 = por %p1705_p6, %p1704_p5 }
  0x52   : > { %p1700_p12 = pneg %p1699_p13 }
  0x54   : > { %p1707_p2 = pnand %p1706_p1, %p1700_p12 }
  0x56   : > { %1710 = shalt.err (!%p1707_p2)
}
  0x57   : > { %1371 = dma.hbm_to_vmem [thread:$0]  (!%p1984_p0), %s306_s1, 1024, %s309_s29, %s1996_s8  }
  0x58   : > { %s346_s30 = scalar_lea.hbm %s2300_s4, %s1980_s15  ;;  %s339_s25 = scalar_lea.vmem [#allocation11], %s1977_s14 }
  0x59   : > { %s348_s28 = sshll.u32 %s339_s25, 4  ;;  %s1865_s26 = smov [#allocation11]   ;;  %s349_s28 = int_to_ptr.vmem [resolvable:$true] %s348_s28 }
  0x5a   : > { %s1724_s17 = scalar_lea.vmem %s349_s28, 1024  ;;  %s1729_s3 = sshll.u32 %s1865_s26, 4  ;;  %s1730_s3 = int_to_ptr.vmem [resolvable:$false] %s1729_s3 }
  0x5b   : > { %p1725_p7 = scmp.ne.s32.totalorder %s349_s28, %s1724_s17  ;;  %s1731_s12 = scalar_lea.vmem %s1730_s3, 2048 }
  0x5c   : > { %p1732_p12 = scmp.lt.s32.totalorder %s349_s28, %s1730_s3  ;;  %p1733_p5 = scmp.lt.s32.totalorder %s1731_s12, %s1724_s17 }
  0x5d   : > { %p1727_p10 = pnand %p1725_p7, %p2000_p3 }
  0x5e   : > { %p1734_p6 = por %p1733_p5, %p1732_p12 }
  0x5f   : > { %p1728_p13 = pneg %p1727_p10 }
  0x61   : > { %p1735_p1 = pnand %p1734_p6, %p1728_p13 }
  0x63   : > { %1738 = shalt.err (!%p1735_p1)
}
  0x64   : > { %1377 = dma.hbm_to_vmem [thread:$0]  (!%p1984_p0), %s346_s30, 1024, %s349_s28, %s2022_s11  }
  0x65   : > { %s366_s29 = scalar_lea.hbm %s2301_s5, %s1980_s15  ;;  %s359_s23 = scalar_lea.vmem [#allocation12], %s1977_s14 }
  0x66   : > { %s368_s19 = sshll.u32 %s359_s23, 4  ;;  %s356_s20 = scalar_lea.sflag [#allocation13], %s1974_s13  ;;  %s369_s19 = int_to_ptr.vmem [resolvable:$true] %s368_s19 }
  0x67   : > { %s1752_s25 = scalar_lea.vmem %s369_s19, 1024  ;;  %s1866_s17 = smov [#allocation12]  }
  0x68   : > { %p1753_p2 = scmp.ne.s32.totalorder %s369_s19, %s1752_s25  ;;  %s1757_s26 = sshll.u32 %s1866_s17, 4  ;;  %s1758_s26 = int_to_ptr.vmem [resolvable:$false] %s1757_s26 }
  0x69   : > { %s1759_s3 = scalar_lea.vmem %s1758_s26, 2048  ;;  %p1760_p13 = scmp.lt.s32.totalorder %s369_s19, %s1758_s26 }
  0x6a   : > { %p1755_p7 = pnand %p1753_p2, %p2000_p3  ;;  %p1761_p12 = scmp.lt.s32.totalorder %s1759_s3, %s1752_s25 }
  0x6c   : > { %p1756_p10 = pneg %p1755_p7  ;;  %p1762_p5 = por %p1761_p12, %p1760_p13 }
  0x6e   : > { %p1763_p6 = pnand %p1762_p5, %p1756_p10 }
  0x70   : > { %1766 = shalt.err (!%p1763_p6)
}
  0x71   : > { %1380 = dma.hbm_to_vmem [thread:$0]  (!%p1984_p0), %s366_s29, 1024, %s369_s19, %s356_s20  }
  0x72   : > { %377 = sbr.rel (%p2013_p4) target bundleno = 636 (0x27c), region = 44  ;;  %s2072_s11 = sand.u32 (!%p2013_p4), 1, %s1843_s22  }
  0x73   : > { %s1320_s13 = sshll.u32 (!%p2013_p4), %s2072_s11, 6  ;;  %s380_s14 = scalar_lea.sflag (!%p2013_p4), [#allocation4], %s2072_s11 }
  0x74   : > { %s2076_s15 = scalar_lea.vmem (!%p2013_p4), [#allocation3], %s1320_s13 }
  0x77   : > { %1818 = dma.done.wait (%p1956_p8), %s380_s14, 1024  }
  0x78   : > { %1820 = vsyncadd (%p1956_p8), %s380_s14, 4294966272  ;;  %s388_s16 = sand.u32 1, %s1936_s27   ;;  %s2083_s18 = scalar_lea.vmem [#allocation6], %s1320_s13 }
  0x79   : > { %s389_s7 = scalar_lea.sflag [#allocation7], %s388_s16 }
  0x7a   : > { %1822 = dma.done.wait (%p1956_p8), %s389_s7, 2048  }
  0x7b   : > { %1824 = vsyncadd (%p1956_p8), %s389_s7, 4294965248  ;;  %s401_s30 = scalar_lea.vmem [#allocation8], %s1320_s13  ;;  %s407_s28 = scalar_lea.sflag [#allocation10], %s388_s16 }
  0x7c   : > { %s2089_s12 = scalar_lea.vmem [#allocation9], %s1320_s13 }
  0x7d   : > { %1826 = dma.done.wait (%p1956_p8), %s407_s28, 2048  }
  0x7e   : > { %1828 = vsyncadd (%p1956_p8), %s407_s28, 4294965248  ;;  %s2095_s27 = scalar_lea.vmem [#allocation11], %s1320_s13  ;;  %s425_s8 = scalar_lea.sflag [#allocation13], %s2072_s11 }
  0x7f   : > { %s2098_s1 = scalar_lea.vmem [#allocation12], %s1320_s13 }
  0x80   : > { %1830 = dma.done.wait (%p1956_p8), %s425_s8, 1024  }
  0x81   : > { %1832 = vsyncadd (%p1956_p8), %s425_s8, 4294966272  ;;  %v728_v0 = vld [vmem:[%s401_s30] sm:$0xff]  ;;  %v729_v1 = vld [vmem:[%s401_s30 + $0x8] sm:$0xff]  ;;  %vm492_vm0 = vcmask 0   ;;  %s1326_s25 = sshll.u32 %s2072_s11, 3  ;;  %s1329_s3 = sshll.u32 %s1851_s24, 7 }
  0x82   : > { %1439 = vlog2.f32 %v728_v0  ;;  %v730_v2 = vld [vmem:[%s401_s30 + $0x10] sm:$0xff]  ;;  %v731_v3 = vld [vmem:[%s401_s30 + $0x18] sm:$0xff]  ;;  %v732_v4 = vld [vmem:[%s401_s30 + $0x20] sm:$0xff]  ;;  %v760_v6 = vsub.f32 1.0, %v728_v0  ;;  %v761_v8 = vsub.f32 1.0, %v729_v1  ;;  %s481_s17 = scalar_lea.vmem [#allocation14], %s1326_s25 }
  0x83   : > { %1441 = vlog2.f32 %v729_v1  ;;  %v733_v5 = vld [vmem:[%s401_s30 + $0x28] sm:$0xff]  ;;  %v734_v7 = vld [vmem:[%s401_s30 + $0x30] sm:$0xff]  ;;  %v735_v9 = vld [vmem:[%s401_s30 + $0x38] sm:$0xff]  ;;  %v762_v10 = vsub.f32 1.0, %v730_v2  ;;  %v763_v11 = vsub.f32 1.0, %v731_v3  ;;  %v764_v12 = vsub.f32 1.0, %v732_v4 }
  0x84   : > { %1443 = vlog2.f32 %v730_v2  ;;  %v765_v13 = vsub.f32 1.0, %v733_v5  ;;  %v766_v14 = vsub.f32 1.0, %v734_v7  ;;  %v767_v15 = vsub.f32 1.0, %v735_v9  ;;  %v502_v19 = vld [vmem:[%s2076_s15] sm:$0xff]  ;;  %v503_v21 = vld [vmem:[%s2076_s15 + $0x8] sm:$0xff]  ;;  %v504_v25 = vld [vmem:[%s2076_s15 + $0x10] sm:$0xff] }
  0x85   : > { %1445 = vlog2.f32 %v731_v3  ;;  %v505_v26 = vld [vmem:[%s2076_s15 + $0x18] sm:$0xff]  ;;  %v534_v30 = vsub.f32 1.0, %v502_v19  ;;  %v535_v34 = vsub.f32 1.0, %v503_v21  ;;  %v536_v37 = vsub.f32 1.0, %v504_v25  ;;  %v2115_v47 = vld [vmem:[%s2076_s15 + $0x20] sm:$0xff]  ;;  %v2125_v62 = vld [vmem:[%s2098_s1 + $0x8] sm:$0xff] }
  0x86   : > { %1447 = vlog2.f32 %v732_v4  ;;  %v537_v38 = vsub.f32 1.0, %v505_v26  ;;  %v2121_v57 = vld [vmem:[%s2098_s1] sm:$0xff]  ;;  %v2128_v3 = vld [vmem:[%s2098_s1 + $0x10] sm:$0xff]  ;;  %s1104_s26 = sshll.u32 %s481_s17, 4  ;;  %s1091_s16 = scalar_lea.sflag [#allocation5], %s2072_s11  ;;  %s2251_s26 = int_to_ptr.vmem [resolvable:$true] %s1104_s26 }
  0x87   : > { %1449 = vlog2.f32 %v733_v5  ;;  %s1767_s7 = scalar_lea.vmem %s2251_s26, 128 }
  0x88   : > { %1451 = vlog2.f32 %v734_v7  ;;  %p1768_p8 = scmp.ne.s32.totalorder %s2251_s26, %s1767_s7 }
  0x89   : > { %1453 = vlog2.f32 %v735_v9 }
  0x8a   : > { %1455 = vlog2.f32 %v760_v6  ;;  %p1769_p0 = pnand %p1768_p8, %p1960_p9 }
  0x8b   : > { %1457 = vlog2.f32 %v761_v8  ;;  %v2131_v8 = vld [vmem:[%s2098_s1 + $0x18] sm:$0xff] }
  0x8c   : > { %1459 = vlog2.f32 %v762_v10  ;;  %p1770_p3 = pneg %p1769_p0 }
  0x8d   : > { %1461 = vlog2.f32 %v763_v11 }
  0x8e   : > { %1463 = vlog2.f32 %v764_v12 }
  0x8f   : > { %v1440_v16 = vpop.eup %1439  ;;  %1465 = vlog2.f32 %v765_v13  ;;  %v2135_v13 = vld [vmem:[%s2098_s1 + $0x20] sm:$0xff] }
  0x90   : > { %v1442_v17 = vpop.eup %1441  ;;  %1467 = vlog2.f32 %v766_v14  ;;  %v737_v23 = vmul.f32 0.6931472, %v1440_v16 }
  0x91   : > { %v1444_v18 = vpop.eup %1443  ;;  %1469 = vlog2.f32 %v767_v15  ;;  %v739_v24 = vmul.f32 0.6931472, %v1442_v17 }
  0x92   : > { %v1446_v20 = vpop.eup %1445  ;;  %v741_v28 = vmul.f32 0.6931472, %v1444_v18  ;;  %1471 = vlog2.f32 %v502_v19  ;;  %v752_v41 = vmax.f32 %v737_v23, -100.0  ;;  %v2139_v18 = vld [vmem:[%s2098_s1 + $0x28] sm:$0xff]  ;;  %v2143_v23 = vld [vmem:[%s2098_s1 + $0x30] sm:$0xff] }
  0x93   : > { %v1448_v22 = vpop.eup %1447  ;;  %v743_v29 = vmul.f32 0.6931472, %v1446_v20  ;;  %1473 = vlog2.f32 %v503_v21  ;;  %v753_v42 = vmax.f32 %v739_v24, -100.0 }
  0x94   : > { %v1450_v27 = vpop.eup %1449  ;;  %v745_v32 = vmul.f32 0.6931472, %v1448_v22  ;;  %1475 = vlog2.f32 %v504_v25  ;;  %v754_v44 = vmax.f32 %v741_v28, -100.0 }
  0x95   : > { %v1452_v31 = vpop.eup %1451  ;;  %v2108_v33 = vmul.f32 0.6931472, %v1450_v27  ;;  %v755_v45 = vmax.f32 %v743_v29, -100.0  ;;  %1477 = vlog2.f32 %v505_v26  ;;  %v2147_v29 = vld [vmem:[%s2098_s1 + $0x38] sm:$0xff] }
  0x96   : > { %v1454_v35 = vpop.eup %1453  ;;  %v2110_v36 = vmul.f32 0.6931472, %v1452_v31  ;;  %v756_v49 = vmax.f32 %v745_v32, -100.0  ;;  %1479 = vlog2.f32 %v2115_v47 }
  0x97   : > { %v1456_v39 = vpop.eup %1455  ;;  %v2112_v40 = vmul.f32 0.6931472, %v1454_v35  ;;  %v757_v50 = vmax.f32 %v2108_v33, -100.0  ;;  %1481 = vlog2.f32 %v534_v30 }
  0x98   : > { %v1458_v43 = vpop.eup %1457  ;;  %v769_v46 = vmul.f32 0.6931472, %v1456_v39  ;;  %v758_v53 = vmax.f32 %v2110_v36, -100.0  ;;  %1483 = vlog2.f32 %v535_v34  ;;  %v507_v39 = vld [vmem:[%s2076_s15 + $0x28] sm:$0xff] }
  0x99   : > { %v1460_v48 = vpop.eup %1459  ;;  %v771_v51 = vmul.f32 0.6931472, %v1458_v43  ;;  %v759_v58 = vmax.f32 %v2112_v40, -100.0  ;;  %1485 = vlog2.f32 %v536_v37 }
  0x9a   : > { %v1462_v52 = vpop.eup %1461  ;;  %v773_v54 = vmul.f32 0.6931472, %v1460_v48  ;;  %v784_v55 = vmax.f32 %v769_v46, -100.0  ;;  %1487 = vlog2.f32 %v537_v38 }
  0x9b   : > { %v1464_v56 = vpop.eup %1463  ;;  %v775_v59 = vmul.f32 0.6931472, %v1462_v52  ;;  %v785_v60 = vmax.f32 %v771_v51, -100.0  ;;  %1489 = vlog2.f32 %v507_v39 }
  0x9c   : > { %v1466_v61 = vpop.eup %1465  ;;  %v777_v63 = vmul.f32 0.6931472, %v1464_v56  ;;  %v786_v0 = vmax.f32 %v773_v54, -100.0  ;;  %v792_v1 = vsub.f32 %v752_v41, %v784_v55 }
  0x9d   : > { %v1468_v2 = vpop.eup %1467  ;;  %v779_v4 = vmul.f32 0.6931472, %v1466_v61  ;;  %v787_v5 = vmax.f32 %v775_v59, -100.0  ;;  %v793_v6 = vsub.f32 %v753_v42, %v785_v60  ;;  %v509_v59 = vld [vmem:[%s2076_s15 + $0x38] sm:$0xff] }
  0x9e   : > { %v1470_v7 = vpop.eup %1469  ;;  %v781_v9 = vmul.f32 0.6931472, %v1468_v2  ;;  %v788_v10 = vmax.f32 %v777_v63, -100.0  ;;  %v794_v11 = vsub.f32 %v754_v44, %v786_v0  ;;  %v800_v12 = vmul.f32 %v792_v1, %v2121_v57 }
  0x9f   : > { %v783_v14 = vmul.f32 0.6931472, %v1470_v7  ;;  %v789_v15 = vmax.f32 %v779_v4, -100.0  ;;  %v795_v16 = vsub.f32 %v755_v45, %v787_v5  ;;  %v801_v17 = vmul.f32 %v793_v6, %v2125_v62  ;;  %v1472_v28 = vpop.eup %1471 }
  0xa0   : > { %v790_v19 = vmax.f32 %v781_v9, -100.0  ;;  %v796_v20 = vsub.f32 %v756_v49, %v788_v10  ;;  %v802_v21 = vmul.f32 %v794_v11, %v2128_v3  ;;  %v808_v22 = vadd.f32 %v800_v12, %v784_v55  ;;  %v1474_v34 = vpop.eup %1473 }
  0xa1   : > { %v791_v24 = vmax.f32 %v783_v14, -100.0  ;;  %v797_v25 = vsub.f32 %v757_v50, %v789_v15  ;;  %v803_v26 = vmul.f32 %v795_v16, %v2131_v8  ;;  %v809_v27 = vadd.f32 %v801_v17, %v785_v60  ;;  %v1476_v40 = vpop.eup %1475  ;;  %v508_v50 = vld [vmem:[%s2076_s15 + $0x30] sm:$0xff]  ;;  %s1102_s15 = scalar_lea.hbm %s2302_s6, %s1329_s3 }
  0xa2   : > { %v798_v30 = vsub.f32 %v758_v53, %v790_v19  ;;  %v804_v31 = vmul.f32 %v796_v20, %v2135_v13  ;;  %v810_v32 = vadd.f32 %v802_v21, %v786_v0  ;;  %v816_v33 = vsub.f32 0.0, %v808_v22  ;;  %v1478_v44 = vpop.eup %1477 }
  0xa3   : > { %v799_v35 = vsub.f32 %v759_v58, %v791_v24  ;;  %v805_v36 = vmul.f32 %v797_v25, %v2139_v18  ;;  %v811_v37 = vadd.f32 %v803_v26, %v787_v5  ;;  %v817_v38 = vsub.f32 0.0, %v809_v27  ;;  %v2155_v51 = vpop.eup %1479 }
  0xa4   : > { %v806_v41 = vmul.f32 %v798_v30, %v2143_v23  ;;  %v812_v42 = vadd.f32 %v804_v31, %v788_v10  ;;  %v818_v43 = vsub.f32 0.0, %v810_v32  ;;  %v511_v54 = vmul.f32 0.6931472, %v1472_v28  ;;  %v1482_v55 = vpop.eup %1481  ;;  %v842_v31 = vld [vmem:[%s2089_s12] sm:$0xff] }
  0xa5   : > { %v807_v45 = vmul.f32 %v799_v35, %v2147_v29  ;;  %v813_v46 = vadd.f32 %v805_v36, %v789_v15  ;;  %v819_v48 = vsub.f32 0.0, %v811_v37  ;;  %v824_v49 = vadd.f32 %v817_v38, %v816_v33  ;;  %v1484_v63 = vpop.eup %1483  ;;  %v843_v35 = vld [vmem:[%s2089_s12 + $0x8] sm:$0xff] }
  0xa6   : > { %v814_v52 = vadd.f32 %v806_v41, %v790_v19  ;;  %v820_v53 = vsub.f32 0.0, %v812_v42  ;;  %1491 = vlog2.f32 %v508_v50  ;;  %v513_v60 = vmul.f32 0.6931472, %v1474_v34  ;;  %v1486_v2 = vpop.eup %1485 }
  0xa7   : > { %v815_v56 = vadd.f32 %v807_v45, %v791_v24  ;;  %v825_v58 = vadd.f32 %v824_v49, %v818_v43  ;;  %v515_v61 = vmul.f32 0.6931472, %v1476_v40  ;;  %v538_v0 = vsub.f32 1.0, %v2115_v47  ;;  %v1488_v7 = vpop.eup %1487  ;;  %v845_v43 = vld [vmem:[%s2089_s12 + $0x18] sm:$0xff] }
  0xa8   : > { %v539_v1 = vsub.f32 1.0, %v507_v39  ;;  %v821_v4 = vsub.f32 0.0, %v813_v46  ;;  %v517_v6 = vmul.f32 0.6931472, %v1478_v44  ;;  %1493 = vlog2.f32 %v509_v59  ;;  %v1490_v36 = vpop.eup %1489  ;;  %v844_v39 = vld [vmem:[%s2089_s12 + $0x10] sm:$0xff]  ;;  %v846_v46 = vld [vmem:[%s2089_s12 + $0x20] sm:$0xff] }
  0xa9   : > { %v826_v5 = vadd.f32 %v825_v58, %v819_v48  ;;  %v822_v9 = vsub.f32 0.0, %v814_v52  ;;  %v526_v10 = vmax.f32 %v511_v54, -100.0  ;;  %v540_v11 = vsub.f32 1.0, %v508_v50  ;;  %v847_v54 = vld [vmem:[%s2089_s12 + $0x28] sm:$0xff] }
  0xaa   : > { %v541_v12 = vsub.f32 1.0, %v509_v59  ;;  %v823_v14 = vsub.f32 0.0, %v815_v56  ;;  %v527_v16 = vmax.f32 %v513_v60, -100.0  ;;  %v528_v17 = vmax.f32 %v515_v61, -100.0  ;;  %v848_v56 = vld [vmem:[%s2089_s12 + $0x30] sm:$0xff] }
  0xab   : > { %v827_v15 = vadd.f32 %v826_v5, %v820_v53  ;;  %v543_v19 = vmul.f32 0.6931472, %v1482_v55  ;;  %v545_v20 = vmul.f32 0.6931472, %v1484_v63  ;;  %v547_v21 = vmul.f32 0.6931472, %v1486_v2 }
  0xac   : > { %1495 = vlog2.f32 %v538_v0  ;;  %v529_v22 = vmax.f32 %v517_v6, -100.0  ;;  %v549_v24 = vmul.f32 0.6931472, %v1488_v7  ;;  %v874_v48 = vsub.f32 1.0, %v842_v31 }
  0xad   : > { %v828_v47 = vadd.f32 %v827_v15, %v821_v4  ;;  %1497 = vlog2.f32 %v539_v1  ;;  %v558_v25 = vmax.f32 %v543_v19, -100.0  ;;  %v559_v26 = vmax.f32 %v545_v20, -100.0  ;;  %v849_v1 = vld [vmem:[%s2089_s12 + $0x38] sm:$0xff] }
  0xae   : > { %1499 = vlog2.f32 %v540_v11  ;;  %v560_v27 = vmax.f32 %v547_v21, -100.0  ;;  %v561_v30 = vmax.f32 %v549_v24, -100.0  ;;  %v875_v49 = vsub.f32 1.0, %v843_v35 }
  0xaf   : > { %v829_v28 = vadd.f32 %v828_v47, %v822_v9  ;;  %1501 = vlog2.f32 %v541_v12  ;;  %v566_v32 = vsub.f32 %v526_v10, %v558_v25  ;;  %v567_v33 = vsub.f32 %v527_v16, %v559_v26 }
  0xb0   : > { %v568_v34 = vsub.f32 %v528_v17, %v560_v27  ;;  %1503 = vlog2.f32 %v842_v31  ;;  %v569_v38 = vsub.f32 %v529_v22, %v561_v30  ;;  %v519_v55 = vmul.f32 0.6931472, %v2155_v51 }
  0xb1   : > { %v830_v37 = vadd.f32 %v829_v28, %v823_v14  ;;  %1505 = vlog2.f32 %v843_v35  ;;  %v574_v40 = vmul.f32 %v566_v32, %v2121_v57  ;;  %v575_v41 = vmul.f32 %v567_v33, %v2125_v62 }
  0xb2   : > { %v576_v42 = vmul.f32 %v568_v34, %v2128_v3  ;;  %1507 = vlog2.f32 %v844_v39  ;;  %v577_v45 = vmul.f32 %v569_v38, %v2131_v8  ;;  %v876_v58 = vsub.f32 1.0, %v844_v39 }
  0xb3   : > { %v1492_v44 = vpop.eup %1491  ;;  %831 = vadd.xlane.f32.xlu1 %v830_v37  ;;  %1509 = vlog2.f32 %v845_v43  ;;  %v582_v50 = vadd.f32 %v574_v40, %v558_v25  ;;  %v583_v52 = vadd.f32 %v575_v41, %v559_v26  ;;  %v877_v59 = vsub.f32 1.0, %v845_v43 }
  0xb4   : > { %v584_v53 = vadd.f32 %v576_v42, %v560_v27  ;;  %1511 = vlog2.f32 %v846_v46  ;;  %v521_v61 = vmul.f32 0.6931472, %v1490_v36  ;;  %v523_v2 = vmul.f32 0.6931472, %v1492_v44 }
  0xb5   : > { %1513 = vlog2.f32 %v847_v54  ;;  %v1494_v60 = vpop.eup %1493  ;;  %v590_v63 = vsub.f32 0.0, %v582_v50  ;;  %v591_v0 = vsub.f32 0.0, %v583_v52  ;;  %v585_v4 = vadd.f32 %v577_v45, %v561_v30 }
  0xb6   : > { %1515 = vlog2.f32 %v848_v56  ;;  %v878_v5 = vsub.f32 1.0, %v846_v46  ;;  %v592_v6 = vsub.f32 0.0, %v584_v53  ;;  %v879_v9 = vsub.f32 1.0, %v847_v54 }
  0xb7   : > { %1517 = vlog2.f32 %v849_v1  ;;  %v598_v7 = vadd.f32 %v591_v0, %v590_v63  ;;  %v525_v51 = vmul.f32 0.6931472, %v1494_v60  ;;  %v880_v11 = vsub.f32 1.0, %v848_v56 }
  0xb8   : > { %1519 = vlog2.f32 %v874_v48  ;;  %v881_v12 = vsub.f32 1.0, %v849_v1  ;;  %v530_v15 = vmax.f32 %v519_v55, -100.0  ;;  %v531_v16 = vmax.f32 %v521_v61, -100.0 }
  0xb9   : > { %v1496_v10 = vpop.eup %1495  ;;  %1521 = vlog2.f32 %v875_v49  ;;  %v532_v20 = vmax.f32 %v523_v2, -100.0  ;;  %v593_v47 = vsub.f32 0.0, %v585_v4  ;;  %v599_v26 = vadd.f32 %v598_v7, %v592_v6 }
  0xba   : > { %v1498_v14 = vpop.eup %1497  ;;  %v551_v17 = vmul.f32 0.6931472, %v1496_v10  ;;  %1523 = vlog2.f32 %v876_v58  ;;  %v533_v28 = vmax.f32 %v525_v51, -100.0 }
  0xbb   : > { %v1500_v19 = vpop.eup %1499  ;;  %v553_v21 = vmul.f32 0.6931472, %v1498_v14  ;;  %1525 = vlog2.f32 %v877_v59  ;;  %v600_v43 = vadd.f32 %v599_v26, %v593_v47 }
  0xbc   : > { %v1502_v22 = vpop.eup %1501  ;;  %v555_v24 = vmul.f32 0.6931472, %v1500_v19  ;;  %v562_v25 = vmax.f32 %v551_v17, -100.0  ;;  %1527 = vlog2.f32 %v878_v5  ;;  %v2192_v17 = vld [vmem:[%s2083_s18] sm:$0xff] }
  0xbd   : > { %v1504_v27 = vpop.eup %1503  ;;  %v557_v30 = vmul.f32 0.6931472, %v1502_v22  ;;  %v563_v31 = vmax.f32 %v553_v21, -100.0  ;;  %1529 = vlog2.f32 %v879_v9  ;;  %v2195_v22 = vld [vmem:[%s2083_s18 + $0x8] sm:$0xff] }
  0xbe   : > { %v1506_v32 = vpop.eup %1505  ;;  %v564_v33 = vmax.f32 %v555_v24, -100.0  ;;  %v570_v34 = vsub.f32 %v530_v15, %v562_v25  ;;  %v2172_v35 = vmul.f32 0.6931472, %v1504_v27  ;;  %1531 = vlog2.f32 %v880_v11 }
  0xbf   : > { %v1508_v36 = vpop.eup %1507  ;;  %v565_v37 = vmax.f32 %v557_v30, -100.0  ;;  %v571_v38 = vsub.f32 %v531_v16, %v563_v31  ;;  %v2174_v39 = vmul.f32 0.6931472, %v1506_v32  ;;  %1533 = vlog2.f32 %v881_v12 }
  0xc0   : > { %v1510_v40 = vpop.eup %1509  ;;  %v572_v41 = vsub.f32 %v532_v20, %v564_v33  ;;  %v578_v42 = vmul.f32 %v570_v34, %v2135_v13  ;;  %v2177_v44 = vmul.f32 0.6931472, %v1508_v36  ;;  %v866_v50 = vmax.f32 %v2172_v35, -100.0 }
  0xc1   : > { %v1512_v45 = vpop.eup %1511  ;;  %v573_v46 = vsub.f32 %v533_v28, %v565_v37  ;;  %v579_v48 = vmul.f32 %v571_v38, %v2139_v18  ;;  %v2180_v49 = vmul.f32 0.6931472, %v1510_v40  ;;  %v867_v56 = vmax.f32 %v2174_v39, -100.0  ;;  %v2199_v28 = vld [vmem:[%s2083_s18 + $0x10] sm:$0xff]  ;;  %v2204_v39 = vld [vmem:[%s2083_s18 + $0x18] sm:$0xff] }
  0xc2   : > { %v1514_v52 = vpop.eup %1513  ;;  %v580_v53 = vmul.f32 %v572_v41, %v2143_v23  ;;  %v586_v54 = vadd.f32 %v578_v42, %v562_v25  ;;  %v2184_v55 = vmul.f32 0.6931472, %v1512_v45  ;;  %v868_v63 = vmax.f32 %v2177_v44, -100.0 }
  0xc3   : > { %v1516_v58 = vpop.eup %1515  ;;  %v581_v59 = vmul.f32 %v573_v46, %v2147_v29  ;;  %v587_v60 = vadd.f32 %v579_v48, %v563_v31  ;;  %v861_v61 = vmul.f32 0.6931472, %v1514_v52  ;;  %v869_v5 = vmax.f32 %v2180_v49, -100.0 }
  0xc4   : > { %v1518_v0 = vpop.eup %1517  ;;  %v588_v1 = vadd.f32 %v580_v53, %v564_v33  ;;  %v594_v2 = vsub.f32 0.0, %v586_v54  ;;  %v863_v4 = vmul.f32 0.6931472, %v1516_v58  ;;  %v870_v51 = vmax.f32 %v2184_v55, -100.0 }
  0xc5   : > { %v1520_v6 = vpop.eup %1519  ;;  %v589_v7 = vadd.f32 %v581_v59, %v565_v37  ;;  %v595_v9 = vsub.f32 0.0, %v587_v60  ;;  %v865_v10 = vmul.f32 0.6931472, %v1518_v0  ;;  %v871_v15 = vmax.f32 %v861_v61, -100.0 }
  0xc6   : > { %v1522_v11 = vpop.eup %1521  ;;  %v596_v12 = vsub.f32 0.0, %v588_v1  ;;  %v601_v14 = vadd.f32 %v600_v43, %v594_v2  ;;  %v883_v16 = vmul.f32 0.6931472, %v1520_v6  ;;  %v872_v21 = vmax.f32 %v863_v4, -100.0 }
  0xc7   : > { %v1524_v19 = vpop.eup %1523  ;;  %v597_v20 = vsub.f32 0.0, %v589_v7  ;;  %v885_v47 = vmul.f32 0.6931472, %v1522_v11  ;;  %1535 = vlog2.f32 %v2192_v17  ;;  %v873_v31 = vmax.f32 %v865_v10, -100.0 }
  0xc8   : > { %v1526_v24 = vpop.eup %1525  ;;  %v602_v25 = vadd.f32 %v601_v14, %v595_v9  ;;  %v887_v26 = vmul.f32 0.6931472, %v1524_v19  ;;  %v898_v27 = vmax.f32 %v883_v16, -100.0  ;;  %1537 = vlog2.f32 %v2195_v22  ;;  %v620_v19 = vld [vmem:[%s2083_s18 + $0x28] sm:$0xff] }
  0xc9   : > { %v1528_v30 = vpop.eup %1527  ;;  %v889_v32 = vmul.f32 0.6931472, %v1526_v24  ;;  %v899_v33 = vmax.f32 %v885_v47, -100.0  ;;  %1539 = vlog2.f32 %v2199_v28 }
  0xca   : > { %v1530_v34 = vpop.eup %1529  ;;  %v603_v35 = vadd.f32 %v602_v25, %v596_v12  ;;  %v891_v36 = vmul.f32 0.6931472, %v1528_v30  ;;  %v900_v37 = vmax.f32 %v887_v26, -100.0  ;;  %v906_v38 = vsub.f32 %v866_v50, %v898_v27 }
  0xcb   : > { %v1532_v40 = vpop.eup %1531  ;;  %v893_v41 = vmul.f32 0.6931472, %v1530_v34  ;;  %v901_v42 = vmax.f32 %v889_v32, -100.0  ;;  %v907_v43 = vsub.f32 %v867_v56, %v899_v33  ;;  %1541 = vlog2.f32 %v2204_v39 }
  0xcc   : > { %v1534_v44 = vpop.eup %1533  ;;  %v604_v45 = vadd.f32 %v603_v35, %v597_v20  ;;  %v895_v46 = vmul.f32 0.6931472, %v1532_v40  ;;  %v902_v48 = vmax.f32 %v891_v36, -100.0  ;;  %v908_v49 = vsub.f32 %v868_v63, %v900_v37 }
  0xcd   : > { %v897_v52 = vmul.f32 0.6931472, %v1534_v44  ;;  %v903_v53 = vmax.f32 %v893_v41, -100.0  ;;  %v909_v54 = vsub.f32 %v869_v5, %v901_v42  ;;  %v914_v55 = vmul.f32 %v906_v38, %v2121_v57 }
  0xce   : > { %605 = vadd.xlane.f32.xlu0 %v604_v45  ;;  %v904_v50 = vmax.f32 %v895_v46, -100.0  ;;  %v910_v58 = vsub.f32 %v870_v51, %v902_v48  ;;  %v915_v59 = vmul.f32 %v907_v43, %v2125_v62  ;;  %v916_v60 = vmul.f32 %v908_v49, %v2128_v3  ;;  %v956_v49 = vld [vmem:[%s2095_s27] sm:$0xff] }
  0xcf   : > { %v905_v56 = vmax.f32 %v897_v52, -100.0  ;;  %v911_v61 = vsub.f32 %v871_v15, %v903_v53  ;;  %v917_v0 = vmul.f32 %v909_v54, %v2131_v8  ;;  %v922_v1 = vadd.f32 %v914_v55, %v898_v27  ;;  %v619_v15 = vld [vmem:[%s2083_s18 + $0x20] sm:$0xff]  ;;  %v621_v27 = vld [vmem:[%s2083_s18 + $0x30] sm:$0xff]  ;;  %v957_v55 = vld [vmem:[%s2095_s27 + $0x8] sm:$0xff] }
  0xd0   : > { %v912_v63 = vsub.f32 %v872_v21, %v904_v50  ;;  %v918_v2 = vmul.f32 %v910_v58, %v2135_v13  ;;  %v923_v4 = vadd.f32 %v915_v59, %v899_v33  ;;  %v924_v5 = vadd.f32 %v916_v60, %v900_v37  ;;  %v959_v58 = vld [vmem:[%s2095_s27 + $0x18] sm:$0xff] }
  0xd1   : > { %v913_v6 = vsub.f32 %v873_v31, %v905_v56  ;;  %v919_v7 = vmul.f32 %v911_v61, %v2139_v18  ;;  %v925_v9 = vadd.f32 %v917_v0, %v901_v42  ;;  %v930_v10 = vsub.f32 0.0, %v922_v1  ;;  %v622_v31 = vld [vmem:[%s2083_s18 + $0x38] sm:$0xff]  ;;  %s1869_s18 = smov [#allocation14]  }
  0xd2   : > { %v920_v51 = vmul.f32 %v912_v63, %v2143_v23  ;;  %v926_v11 = vadd.f32 %v918_v2, %v902_v48  ;;  %v931_v12 = vsub.f32 0.0, %v923_v4  ;;  %v932_v14 = vsub.f32 0.0, %v924_v5  ;;  %s1771_s30 = sshll.u32 %s1869_s18, 4  ;;  %s1772_s30 = int_to_ptr.vmem [resolvable:$false] %s1771_s30 }
  0xd3   : > { %v921_v16 = vmul.f32 %v913_v6, %v2147_v29  ;;  %1543 = vlog2.f32 %v619_v15  ;;  %v647_v20 = vsub.f32 1.0, %v2192_v17  ;;  %v648_v21 = vsub.f32 1.0, %v2195_v22  ;;  %s1773_s24 = scalar_lea.vmem %s1772_s30, 256  ;;  %p1774_p4 = scmp.lt.s32.totalorder %s2251_s26, %s1772_s30 }
  0xd4   : > { %v1536_v47 = vpop.eup %1535  ;;  %v927_v24 = vadd.f32 %v919_v7, %v903_v53  ;;  %v933_v25 = vsub.f32 0.0, %v925_v9  ;;  %v938_v26 = vadd.f32 %v931_v12, %v930_v10  ;;  %1545 = vlog2.f32 %v620_v19  ;;  %p1775_p1 = scmp.lt.s32.totalorder %s1773_s24, %s1767_s7 }
  0xd5   : > { %v1538_v30 = vpop.eup %1537  ;;  %1547 = vlog2.f32 %v621_v27  ;;  %v649_v32 = vsub.f32 1.0, %v2199_v28  ;;  %v650_v33 = vsub.f32 1.0, %v2204_v39  ;;  %v928_v35 = vadd.f32 %v920_v51, %v904_v50  ;;  %v958_v50 = vld [vmem:[%s2095_s27 + $0x10] sm:$0xff] }
  0xd6   : > { %v1540_v34 = vpop.eup %1539  ;;  %v934_v36 = vsub.f32 0.0, %v926_v11  ;;  %v939_v37 = vadd.f32 %v938_v26, %v932_v14  ;;  %1549 = vlog2.f32 %v622_v31  ;;  %v651_v17 = vsub.f32 1.0, %v619_v15  ;;  %p1776_p2 = por %p1775_p1, %p1774_p4 }
  0xd7   : > { %v652_v22 = vsub.f32 1.0, %v620_v19  ;;  %1551 = vlog2.f32 %v647_v20  ;;  %v929_v40 = vadd.f32 %v921_v16, %v905_v56  ;;  %v935_v41 = vsub.f32 0.0, %v927_v24 }
  0xd8   : > { %v1542_v38 = vpop.eup %1541  ;;  %v940_v42 = vadd.f32 %v939_v37, %v933_v25  ;;  %1553 = vlog2.f32 %v648_v21  ;;  %v653_v43 = vsub.f32 1.0, %v621_v27  ;;  %v936_v28 = vsub.f32 0.0, %v928_v35  ;;  %p1777_p7 = pnand %p1776_p2, %p1770_p3 }
  0xd9   : > { %1555 = vlog2.f32 %v649_v32  ;;  %v654_v44 = vsub.f32 1.0, %v622_v31  ;;  %v937_v45 = vsub.f32 0.0, %v929_v40  ;;  %v624_v54 = vmul.f32 0.6931472, %v1536_v47 }
  0xda   : > { %v941_v39 = vadd.f32 %v940_v42, %v934_v36  ;;  %1557 = vlog2.f32 %v650_v33  ;;  %v626_v60 = vmul.f32 0.6931472, %v1538_v30  ;;  %v628_v56 = vmul.f32 0.6931472, %v1540_v34 }
  0xdb   : > { %1559 = vlog2.f32 %v651_v17  ;;  %v630_v61 = vmul.f32 0.6931472, %v1542_v38  ;;  %v988_v2 = vsub.f32 1.0, %v956_v49  ;;  %v989_v6 = vsub.f32 1.0, %v957_v55 }
  0xdc   : > { %v942_v46 = vadd.f32 %v941_v39, %v935_v41  ;;  %1561 = vlog2.f32 %v652_v22  ;;  %v990_v7 = vsub.f32 1.0, %v958_v50  ;;  %v639_v51 = vmax.f32 %v624_v54, -100.0 }
  0xdd   : > { %1563 = vlog2.f32 %v653_v43  ;;  %v991_v11 = vsub.f32 1.0, %v959_v58  ;;  %v640_v14 = vmax.f32 %v626_v60, -100.0  ;;  %v641_v15 = vmax.f32 %v628_v56, -100.0 }
  0xde   : > { %v943_v48 = vadd.f32 %v942_v46, %v936_v28  ;;  %1565 = vlog2.f32 %v654_v44  ;;  %v642_v16 = vmax.f32 %v630_v61, -100.0 }
  0xdf   : > { %1567 = vlog2.f32 %v956_v49 }
  0xe0   : > { %v1544_v52 = vpop.eup %1543  ;;  %v944_v53 = vadd.f32 %v943_v48, %v937_v45  ;;  %1569 = vlog2.f32 %v957_v55 }
  0xe1   : > { %v1546_v59 = vpop.eup %1545  ;;  %v632_v1 = vmul.f32 0.6931472, %v1544_v52  ;;  %1571 = vlog2.f32 %v958_v50 }
  0xe2   : > { %v1548_v0 = vpop.eup %1547  ;;  %945 = vadd.xlane.f32.xlu1 %v944_v53  ;;  %v634_v63 = vmul.f32 0.6931472, %v1546_v59  ;;  %1573 = vlog2.f32 %v959_v58 }
  0xe3   : > { %v1550_v4 = vpop.eup %1549  ;;  %v636_v5 = vmul.f32 0.6931472, %v1548_v0  ;;  %v643_v21 = vmax.f32 %v632_v1, -100.0  ;;  %1575 = vlog2.f32 %v988_v2 }
  0xe4   : > { %v1552_v9 = vpop.eup %1551  ;;  %v638_v10 = vmul.f32 0.6931472, %v1550_v4  ;;  %v644_v47 = vmax.f32 %v634_v63, -100.0  ;;  %1577 = vlog2.f32 %v989_v6 }
  0xe5   : > { %v1554_v12 = vpop.eup %1553  ;;  %v656_v19 = vmul.f32 0.6931472, %v1552_v9  ;;  %v645_v26 = vmax.f32 %v636_v5, -100.0  ;;  %1579 = vlog2.f32 %v990_v7  ;;  %v960_v9 = vld [vmem:[%s2095_s27 + $0x20] sm:$0xff] }
  0xe6   : > { %v1556_v20 = vpop.eup %1555  ;;  %v658_v24 = vmul.f32 0.6931472, %v1554_v12  ;;  %v646_v32 = vmax.f32 %v638_v10, -100.0  ;;  %1581 = vlog2.f32 %v991_v11 }
  0xe7   : > { %v1558_v25 = vpop.eup %1557  ;;  %v660_v27 = vmul.f32 0.6931472, %v1556_v20  ;;  %v671_v30 = vmax.f32 %v656_v19, -100.0  ;;  %1583 = vlog2.f32 %v960_v9  ;;  %v961_v20 = vld [vmem:[%s2095_s27 + $0x28] sm:$0xff] }
  0xe8   : > { %v1560_v31 = vpop.eup %1559  ;;  %v662_v33 = vmul.f32 0.6931472, %v1558_v25  ;;  %v672_v34 = vmax.f32 %v658_v24, -100.0  ;;  %1585 = vlog2.f32 %v961_v20 }
  0xe9   : > { %v1562_v35 = vpop.eup %1561  ;;  %v664_v36 = vmul.f32 0.6931472, %v1560_v31  ;;  %v673_v37 = vmax.f32 %v660_v27, -100.0  ;;  %v679_v17 = vsub.f32 %v639_v51, %v671_v30  ;;  %v962_v31 = vld [vmem:[%s2095_s27 + $0x30] sm:$0xff] }
  0xea   : > { %v1564_v22 = vpop.eup %1563  ;;  %v666_v38 = vmul.f32 0.6931472, %v1562_v35  ;;  %v674_v40 = vmax.f32 %v662_v33, -100.0  ;;  %v680_v41 = vsub.f32 %v640_v14, %v672_v34  ;;  %1587 = vlog2.f32 %v962_v31 }
  0xeb   : > { %v1566_v42 = vpop.eup %1565  ;;  %v668_v43 = vmul.f32 0.6931472, %v1564_v22  ;;  %v675_v28 = vmax.f32 %v664_v36, -100.0  ;;  %v681_v39 = vsub.f32 %v641_v15, %v673_v37  ;;  %v687_v44 = vmul.f32 %v679_v17, %v2121_v57 }
  0xec   : > { %v670_v45 = vmul.f32 0.6931472, %v1566_v42  ;;  %v676_v46 = vmax.f32 %v666_v38, -100.0  ;;  %v682_v48 = vsub.f32 %v642_v16, %v674_v40  ;;  %v688_v49 = vmul.f32 %v680_v41, %v2125_v62  ;;  %v1568_v56 = vpop.eup %1567 }
  0xed   : > { %v677_v52 = vmax.f32 %v668_v43, -100.0  ;;  %v683_v53 = vsub.f32 %v643_v21, %v675_v28  ;;  %v689_v54 = vmul.f32 %v681_v39, %v2128_v3  ;;  %v695_v55 = vadd.f32 %v687_v44, %v671_v30  ;;  %v1570_v2 = vpop.eup %1569 }
  0xee   : > { %v678_v50 = vmax.f32 %v670_v45, -100.0  ;;  %v684_v58 = vsub.f32 %v644_v47, %v676_v46  ;;  %v690_v59 = vmul.f32 %v682_v48, %v2131_v8  ;;  %v696_v60 = vadd.f32 %v688_v49, %v672_v34  ;;  %v1572_v10 = vpop.eup %1571 }
  0xef   : > { %v685_v61 = vsub.f32 %v645_v26, %v677_v52  ;;  %v691_v0 = vmul.f32 %v683_v53, %v2135_v13  ;;  %v697_v1 = vadd.f32 %v689_v54, %v673_v37  ;;  %v703_v63 = vsub.f32 0.0, %v695_v55  ;;  %v1574_v21 = vpop.eup %1573 }
  0xf0   : > { %v686_v4 = vsub.f32 %v646_v32, %v678_v50  ;;  %v692_v5 = vmul.f32 %v684_v58, %v2139_v18  ;;  %v698_v6 = vadd.f32 %v690_v59, %v674_v40  ;;  %v704_v7 = vsub.f32 0.0, %v696_v60  ;;  %v1576_v26 = vpop.eup %1575  ;;  %v963_v32 = vld [vmem:[%s2095_s27 + $0x38] sm:$0xff] }
  0xf1   : > { %v693_v51 = vmul.f32 %v685_v61, %v2143_v23  ;;  %v699_v11 = vadd.f32 %v691_v0, %v675_v28  ;;  %v705_v12 = vsub.f32 0.0, %v697_v1  ;;  %v965_v25 = vmul.f32 0.6931472, %v1568_v56  ;;  %v1578_v35 = vpop.eup %1577 }
  0xf2   : > { %v694_v14 = vmul.f32 %v686_v4, %v2147_v29  ;;  %v700_v15 = vadd.f32 %v692_v5, %v676_v46  ;;  %v706_v16 = vsub.f32 0.0, %v698_v6  ;;  %v711_v19 = vadd.f32 %v704_v7, %v703_v63  ;;  %v1580_v17 = vpop.eup %1579 }
  0xf3   : > { %v701_v47 = vadd.f32 %v693_v51, %v677_v52  ;;  %v707_v24 = vsub.f32 0.0, %v699_v11  ;;  %v967_v33 = vmul.f32 0.6931472, %v1570_v2  ;;  %v969_v34 = vmul.f32 0.6931472, %v1572_v10  ;;  %v1582_v41 = vpop.eup %1581 }
  0xf4   : > { %v702_v27 = vadd.f32 %v694_v14, %v678_v50  ;;  %v712_v30 = vadd.f32 %v711_v19, %v705_v12  ;;  %v992_v36 = vsub.f32 1.0, %v960_v9  ;;  %v993_v37 = vsub.f32 1.0, %v961_v20  ;;  %v1584_v2 = vpop.eup %1583 }
  0xf5   : > { %v708_v22 = vsub.f32 0.0, %v700_v15  ;;  %v971_v40 = vmul.f32 0.6931472, %v1574_v21  ;;  %1589 = vlog2.f32 %v963_v32  ;;  %v709_v42 = vsub.f32 0.0, %v701_v47  ;;  %v1586_v10 = vpop.eup %1585 }
  0xf6   : > { %v713_v38 = vadd.f32 %v712_v30, %v706_v16  ;;  %v980_v43 = vmax.f32 %v965_v25, -100.0  ;;  %v994_v28 = vsub.f32 1.0, %v962_v31  ;;  %v995_v39 = vsub.f32 1.0, %v963_v32 }
  0xf7   : > { %v710_v44 = vsub.f32 0.0, %v702_v27  ;;  %v981_v46 = vmax.f32 %v967_v33, -100.0  ;;  %v982_v48 = vmax.f32 %v969_v34, -100.0  ;;  %v997_v49 = vmul.f32 0.6931472, %v1576_v26  ;;  %v1588_v12 = vpop.eup %1587 }
  0xf8   : > { %v714_v45 = vadd.f32 %v713_v38, %v707_v24  ;;  %v999_v52 = vmul.f32 0.6931472, %v1578_v35  ;;  %v1001_v53 = vmul.f32 0.6931472, %v1580_v17  ;;  %1591 = vlog2.f32 %v992_v36 }
  0xf9   : > { %v983_v55 = vmax.f32 %v971_v40, -100.0  ;;  %v1003_v50 = vmul.f32 0.6931472, %v1582_v41  ;;  %1593 = vlog2.f32 %v993_v37  ;;  %v1012_v58 = vmax.f32 %v997_v49, -100.0 }
  0xfa   : > { %v715_v54 = vadd.f32 %v714_v45, %v708_v22  ;;  %1595 = vlog2.f32 %v994_v28  ;;  %v1013_v59 = vmax.f32 %v999_v52, -100.0  ;;  %v1014_v60 = vmax.f32 %v1001_v53, -100.0 }
  0xfb   : > { %1597 = vlog2.f32 %v995_v39  ;;  %v1015_v61 = vmax.f32 %v1003_v50, -100.0  ;;  %v1020_v0 = vsub.f32 %v980_v43, %v1012_v58  ;;  %v973_v14 = vmul.f32 0.6931472, %v1584_v2 }
  0xfc   : > { %v716_v56 = vadd.f32 %v715_v54, %v709_v42  ;;  %v1021_v1 = vsub.f32 %v981_v46, %v1013_v59  ;;  %v1022_v63 = vsub.f32 %v982_v48, %v1014_v60  ;;  %v975_v47 = vmul.f32 0.6931472, %v1586_v10 }
  0xfd   : > { %v1023_v5 = vsub.f32 %v983_v55, %v1015_v61  ;;  %v1028_v6 = vmul.f32 %v1020_v0, %v2121_v57  ;;  %v977_v24 = vmul.f32 0.6931472, %v1588_v12  ;;  %v984_v26 = vmax.f32 %v973_v14, -100.0 }
  0xfe   : > { %v717_v4 = vadd.f32 %v716_v56, %v710_v44  ;;  %v1029_v7 = vmul.f32 %v1021_v1, %v2125_v62  ;;  %v1030_v9 = vmul.f32 %v1022_v63, %v2128_v3  ;;  %v985_v33 = vmax.f32 %v975_v47, -100.0 }
  0xff   : > { %v1036_v51 = vadd.f32 %v1028_v6, %v1012_v58  ;;  %v1031_v16 = vmul.f32 %v1023_v5, %v2131_v8  ;;  %v986_v36 = vmax.f32 %v977_v24, -100.0 }
 0x100   : > { %718 = vadd.xlane.f32.xlu0 %v717_v4  ;;  %v1037_v11 = vadd.f32 %v1029_v7, %v1013_v59  ;;  %v1038_v19 = vadd.f32 %v1030_v9, %v1014_v60  ;;  %v1868_v9 = vmov 0  }
 0x101   : > { %v1044_v20 = vsub.f32 0.0, %v1036_v51  ;;  %v1039_v3 = vadd.f32 %v1031_v16, %v1015_v61  ;;  %1437 = vset.pattern.permute.xlu1 %v1868_v9  ;;  %1438 = vset.pattern.permute.xlu0 %v1868_v9 }
 0x102   : > { %v1590_v15 = vpop.eup %1589  ;;  %v1045_v21 = vsub.f32 0.0, %v1037_v11  ;;  %v1046_v30 = vsub.f32 0.0, %v1038_v19 }
 0x103   : > { %v979_v57 = vmul.f32 0.6931472, %v1590_v15  ;;  %v1047_v42 = vsub.f32 0.0, %v1039_v3 }
 0x104   : > { %v1052_v31 = vadd.f32 %v1045_v21, %v1044_v20 }
 0x105   : > { %v1592_v25 = vpop.eup %1591  ;;  %v987_v17 = vmax.f32 %v979_v57, -100.0 }
 0x106   : > { %v1594_v62 = vpop.eup %1593  ;;  %v1005_v27 = vmul.f32 0.6931472, %v1592_v25  ;;  %v1053_v43 = vadd.f32 %v1052_v31, %v1046_v30 }
 0x107   : > { %v1596_v32 = vpop.eup %1595  ;;  %v1007_v34 = vmul.f32 0.6931472, %v1594_v62 }
 0x108   : > { %v1598_v35 = vpop.eup %1597  ;;  %v1009_v37 = vmul.f32 0.6931472, %v1596_v32  ;;  %v1016_v8 = vmax.f32 %v1005_v27, -100.0  ;;  %v1054_v53 = vadd.f32 %v1053_v43, %v1047_v42 }
 0x109   : > { %v1011_v22 = vmul.f32 0.6931472, %v1598_v35  ;;  %v1017_v38 = vmax.f32 %v1007_v34, -100.0 }
 0x10a   : > { %v1018_v40 = vmax.f32 %v1009_v37, -100.0  ;;  %v1024_v41 = vsub.f32 %v984_v26, %v1016_v8 }
 0x10b   : > { %v1019_v28 = vmax.f32 %v1011_v22, -100.0  ;;  %v1025_v39 = vsub.f32 %v985_v33, %v1017_v38 }
 0x10c   : > { %v1026_v44 = vsub.f32 %v986_v36, %v1018_v40  ;;  %v1032_v45 = vmul.f32 %v1024_v41, %v2135_v13 }
 0x10d   : > { %v1027_v46 = vsub.f32 %v987_v17, %v1019_v28  ;;  %v1033_v48 = vmul.f32 %v1025_v39, %v2139_v18  ;;  %v1867_v18 = vmov 0.0  }
 0x10e   : > { %v1034_v49 = vmul.f32 %v1026_v44, %v2143_v23  ;;  %v1040_v52 = vadd.f32 %v1032_v45, %v1016_v8  ;;  %493 = vst.msk [vmem:[#allocation2] sm:$0x1] %vm492_vm0, %v1867_v18 }
 0x10f   : > { %v1035_v54 = vmul.f32 %v1027_v46, %v2147_v29  ;;  %v1041_v55 = vadd.f32 %v1033_v48, %v1017_v38 }
 0x110   : > { %v1042_v50 = vadd.f32 %v1034_v49, %v1018_v40  ;;  %v1048_v58 = vsub.f32 0.0, %v1040_v52 }
 0x111   : > { %v1043_v59 = vadd.f32 %v1035_v54, %v1019_v28  ;;  %v1049_v60 = vsub.f32 0.0, %v1041_v55 }
 0x112   : > { %v1050_v56 = vsub.f32 0.0, %v1042_v50  ;;  %v1055_v61 = vadd.f32 %v1054_v53, %v1048_v58 }
 0x113   : > { %v1051_v0 = vsub.f32 0.0, %v1043_v59 }
 0x114   : > { %v1056_v1 = vadd.f32 %v1055_v61, %v1049_v60 }
 0x115   : > { %v1070_v45 = vld [vmem:[#allocation2] sm:$0x1] }
 0x116   : > { %v1057_v63 = vadd.f32 %v1056_v1, %v1050_v56 }
 0x118   : > { %v1058_v13 = vadd.f32 %v1057_v63, %v1051_v0 }
 0x11a   : > { %1059 = vadd.xlane.f32.xlu0 %v1058_v13 }
 0x13c   : > { %v832_v10 = vpop.xlane.xlu1 %831 }
 0x13d   : > { %v833_v12 = vrot.slane %v832_v10, 4 }
 0x13f   : > { %v834_v15 = vadd.f32 %v833_v12, %v832_v10 }
 0x141   : > { %v835_v19 = vrot.slane %v834_v15, 2 }
 0x143   : > { %v836_v25 = vadd.f32 %v835_v19, %v834_v15 }
 0x145   : > { %v837_v27 = vrot.slane %v836_v25, 1 }
 0x147   : > { %v838_v32 = vadd.f32 %v837_v27, %v836_v25 }
 0x157   : > { %v606_v23 = vpop.xlane.xlu0 %605 }
 0x158   : > { %v607_v2 = vrot.slane %v606_v23, 4 }
 0x15a   : > { %v608_v4 = vadd.f32 %v607_v2, %v606_v23 }
 0x15c   : > { %v609_v29 = vrot.slane %v608_v4, 2 }
 0x15e   : > { %v610_v5 = vadd.f32 %v609_v29, %v608_v4 }
 0x160   : > { %v611_v6 = vrot.slane %v610_v5, 1 }
 0x162   : > { %v612_v7 = vadd.f32 %v611_v6, %v610_v5 }
 0x164   : > { %1338 = vpush %v612_v7 }
 0x16b   : > { %v946_v51 = vpop.xlane.xlu1 %945 }
 0x16c   : > { %v947_v11 = vrot.slane %v946_v51, 4 }
 0x16e   : > { %v948_v14 = vadd.f32 %v947_v11, %v946_v51 }
 0x170   : > { %v949_v16 = vrot.slane %v948_v14, 2 }
 0x172   : > { %v950_v24 = vadd.f32 %v949_v16, %v948_v14 }
 0x174   : > { %v951_v62 = vrot.slane %v950_v24, 1 }
 0x176   : > { %v952_v31 = vadd.f32 %v951_v62, %v950_v24 }
 0x189   : > { %v719_v20 = vpop.xlane.xlu0 %718 }
 0x18a   : > { %v720_v21 = vrot.slane %v719_v20, 4 }
 0x18c   : > { %v721_v47 = vadd.f32 %v720_v21, %v719_v20 }
 0x18e   : > { %v722_v57 = vrot.slane %v721_v47, 2 }
 0x190   : > { %v723_v26 = vadd.f32 %v722_v57, %v721_v47 }
 0x192   : > { %v724_v3 = vrot.slane %v723_v26, 1 }
 0x194   : > { %v725_v30 = vadd.f32 %v724_v3, %v723_v26 }
 0x195   : > { %s1339_s9 = spop %1338 }
 0x196   : > { %1340 = vpush %v725_v30  ;;  %v614_v44 = vstv %s1339_s9 }
 0x197   : > { %1342 = vpush %v838_v32 }
 0x198   : > { %1344 = vpush %v952_v31 }
 0x1a3   : > { %v1060_v33 = vpop.xlane.xlu0 %1059 }
 0x1a4   : > { %v1061_v34 = vrot.slane %v1060_v33, 4 }
 0x1a6   : > { %v1062_v35 = vadd.f32 %v1061_v34, %v1060_v33 }
 0x1a8   : > { %v1063_v36 = vrot.slane %v1062_v35, 2 }
 0x1aa   : > { %v1064_v37 = vadd.f32 %v1063_v36, %v1062_v35 }
 0x1ac   : > { %v1065_v8 = vrot.slane %v1064_v37, 1 }
 0x1ae   : > { %v1066_v17 = vadd.f32 %v1065_v8, %v1064_v37 }
 0x1b0   : > { %1346 = vpush %v1066_v17 }
 0x1c7   : > { %s1341_s29 = spop %1340 }
 0x1c8   : > { %s1343_s23 = spop %1342  ;;  %v727_v22 = vstv %s1341_s29 }
 0x1c9   : > { %v840_v38 = vstv %s1343_s23  ;;  %s1345_s19 = spop %1344 }
 0x1ca   : > { %v841_v40 = vadd.f32 %v840_v38, %v727_v22  ;;  %v954_v41 = vstv %s1345_s19 }
 0x1cc   : > { %v955_v42 = vadd.f32 %v954_v41, %v841_v40 }
 0x1e1   : > { %s1347_s20 = spop %1346 }
 0x1e2   : > { %v1068_v43 = vstv %s1347_s20 }
 0x1e3   : > { %v1069_v28 = vadd.f32 %v1068_v43, %v955_v42 }
 0x1e5   : > { %v1071_v39 = vmul.f32 0.4, %v1069_v28 }
 0x1e7   : > { %v1072_v46 = vadd.f32 %v1071_v39, %v614_v44 }
 0x1e9   : > { %v1073_v48 = vadd.f32 %v1072_v46, %v1070_v45 }
 0x1eb   : > { %1075 = vst.msk [vmem:[#allocation2] sm:$0x1] %vm492_vm0, %v1073_v48 }
 0x1f2   : > { %v1327_v49 = vld [vmem:[#allocation2] ss:$0 sm:$0xff] }
 0x1f3   : > { %1086 = vperm.xlu1 %1437, %v1327_v49  }
 0x26e   : > { %v1087_v52 = vpop.permute.xlu1 %1086 }
 0x26f   : > { %1089 = vst [vmem:[%s481_s17] sm:$0xff] %v1087_v52 }
 0x270   : > { %1780 = shalt.err (!%p1777_p7)
}
 0x271   : > { %s1781_s28 = scalar_lea.hbm %s1102_s15, 128  ;;  %s1785_s27 = scalar_lea.hbm %s2302_s6, 256 }
 0x272   : > { %p1782_p10 = scmp.ne.s32.totalorder %s1102_s15, %s1781_s28  ;;  %p1786_p5 = scmp.lt.s32.totalorder %s1102_s15, %s2302_s6 }
 0x273   : > { %p1787_p6 = scmp.lt.s32.totalorder %s1785_s27, %s1781_s28 }
 0x274   : > { %p1783_p13 = pnand %p1782_p10, %p1960_p9 }
 0x275   : > { %p1788_p8 = por %p1787_p6, %p1786_p5 }
 0x276   : > { %p1784_p12 = pneg %p1783_p13 }
 0x278   : > { %p1789_p0 = pnand %p1788_p8, %p1784_p12 }
 0x27a   : > { %1792 = shalt.err (!%p1789_p0)
}
 0x27b   : > { %1360 = dma.vmem_to_hbm [thread:$0]  (%p1960_p9), %s2251_s26, 128, %s1102_s15, %s1091_s16  }
 0x27c PF: > { %s2327_s29 = sld [smem:[#allocation22_spill]]  ;;  %s1116_s23 = sand.u32 1, %s1839_s21  }
 0x27d   : > { %s1117_s19 = scalar_lea.sflag [#allocation5], %s1116_s23 }
 0x282   : > { %p2328_p3 = scmp.ge.s32.totalorder %s2327_s29, 2 }
 0x284   : > { %p1382_p4 = pnand %p2328_p3, %p1967_p11 }
 0x286   : > { %p1383_p1 = pneg %p1382_p4 }
 0x288   : > { %1834 = dma.done.wait (%p1383_p1), %s1117_s19, 128  }
 0x289   : > { %1836 = vsyncadd (%p1383_p1), %s1117_s19, 4294967168  ;;  %s31_s26 = sadd.s32 1, %s2327_s29   ;;  %s2329_s20 = sld [smem:[#allocation20_spill]] }
 0x28a   : > { %p28_p2 = scmp.ge.s32.totalorder %s31_s26, 4   ;;  %s2330_s23 = sld [smem:[#allocation24_spill]] }
 0x28b   : > { %s2331_s24 = sld [smem:[#allocation21_spill]]  ;;  %s2333_s21 = smov %s1843_s22 }
 0x28c   : > { %s2332_s25 = sld [smem:[#allocation23_spill]]  ;;  %30 = sbr.rel (!%p28_p2) target bundleno = 15 (0xf), region = 158 }
 0x28f   : > { %s2334_s22 = smov %s2329_s20 }
 0x291   :  { %1122 = vsyncpa [#allocation4], 1 }
 0x292   :  { %1124 = vsyncpa [#allocation4 + $0x1], 1 }
 0x293   :  { %1125 = vsyncpa [#allocation7], 1 }
 0x294   :  { %1127 = vsyncpa [#allocation7 + $0x1], 1 }
 0x295   :  { %1128 = vsyncpa [#allocation10], 1 }
 0x296   :  { %1130 = vsyncpa [#allocation10 + $0x1], 1 }
 0x297   :  { %1131 = vsyncpa [#allocation13], 1 }
 0x298   :  { %1133 = vsyncpa [#allocation13 + $0x1], 1 }
 0x299   :  { %1134 = vsyncpa [#allocation5], 1 }
 0x29a   :  { %1136 = vsyncpa [#allocation5 + $0x1], 1 }

</bundles_post_ra>
